<compile_context>
chip_gen: v5e
topology: v5e:2x2
jax: 0.10.0
libtpu: 0.0.40
codegen_flags: <defaults>
</compile_context>

<pallas_src>
import functools

import jax
import jax.numpy as jnp
from jax.experimental import pallas as pl
from jax.experimental.pallas import tpu as pltpu


def _round_up(x, m):
    return ((x + m - 1) // m) * m


def _pad2(a, rows, cols, dtype):
    r, c = a.shape
    a = a.astype(dtype)
    if (r, c) != (rows, cols):
        a = jnp.pad(a, ((0, rows - r), (0, cols - c)))
    return a


# ----------------------------------------------------------------------------
# Pallas kernels: tiled X @ W with f32 accumulation; epilogue applies the
# folded BN affine (+ optional residual) and optional ReLU.
# ----------------------------------------------------------------------------
def _fused_matmul_kernel(x_ref, w_ref, scale_ref, bias_ref, o_ref, acc_ref, *,
                         relu):
    k = pl.program_id(2)

    @pl.when(k == 0)
    def _():
        acc_ref[...] = jnp.zeros_like(acc_ref)

    acc_ref[...] += jnp.dot(x_ref[...], w_ref[...],
                            preferred_element_type=jnp.float32)

    @pl.when(k == pl.num_programs(2) - 1)
    def _():
        out = acc_ref[...] * scale_ref[...] + bias_ref[...]
        if relu:
            out = jnp.maximum(out, 0.0)
        o_ref[...] = out.astype(o_ref.dtype)


def _fused_matmul_res_kernel(x_ref, w_ref, scale_ref, bias_ref, res_ref, o_ref,
                             acc_ref):
    k = pl.program_id(2)

    @pl.when(k == 0)
    def _():
        acc_ref[...] = jnp.zeros_like(acc_ref)

    acc_ref[...] += jnp.dot(x_ref[...], w_ref[...],
                            preferred_element_type=jnp.float32)

    @pl.when(k == pl.num_programs(2) - 1)
    def _():
        out = acc_ref[...] * scale_ref[...] + bias_ref[...]
        out = out + res_ref[...].astype(jnp.float32)
        o_ref[...] = jnp.maximum(out, 0.0).astype(o_ref.dtype)


def matmul_affine(x, w, scale, bias, residual=None, relu=True,
                  tm=512, tn=256, tk=512):
    """out = act((x @ w) * scale + bias [+ residual]).

    x: (M, K), w: (K, N), scale/bias: (N,), residual: (M, N).
    Operands are zero-padded to lane/tile-aligned shapes, cast to bf16 for the
    MXU, accumulated in f32, and the affine/ReLU epilogue runs once per output
    tile.  Output is f32 (padding sliced off).
    """
    M, K = x.shape
    Kw, N = w.shape
    assert K == Kw

    # Tile sizes: lane dim multiples of 128, sublane multiples of 8; clamp to
    # the (padded) problem size so small problems stay a single block.
    tn = min(tn, _round_up(N, 128))
    tk = min(tk, _round_up(K, 128))
    tm = min(tm, _round_up(M, 8))
    Mp, Kp, Np = _round_up(M, tm), _round_up(K, tk), _round_up(N, tn)

    xb = _pad2(x, Mp, Kp, jnp.bfloat16)
    wb = _pad2(w, Kp, Np, jnp.bfloat16)
    sc = _pad2(scale.reshape(1, N), 1, Np, jnp.float32)
    bs = _pad2(bias.reshape(1, N), 1, Np, jnp.float32)

    grid = (Mp // tm, Np // tn, Kp // tk)

    in_specs = [
        pl.BlockSpec((tm, tk), lambda i, j, k: (i, k)),
        pl.BlockSpec((tk, tn), lambda i, j, k: (k, j)),
        pl.BlockSpec((1, tn), lambda i, j, k: (0, j)),
        pl.BlockSpec((1, tn), lambda i, j, k: (0, j)),
    ]
    args = [xb, wb, sc, bs]
    res_bytes = 0

    if residual is not None:
        rb = _pad2(residual, Mp, Np, jnp.bfloat16)
        # Block index independent of k -> DMA'd once per output tile.
        in_specs.append(pl.BlockSpec((tm, tn), lambda i, j, k: (i, j)))
        args.append(rb)
        res_bytes = Mp * Np * 2
        kernel = _fused_matmul_res_kernel
    else:
        kernel = functools.partial(_fused_matmul_kernel, relu=relu)

    cost = pl.CostEstimate(
        flops=2 * Mp * Np * Kp,
        transcendentals=0,
        bytes_accessed=Mp * Kp * 2 + Kp * Np * 2 + Mp * Np * 4 + res_bytes,
    )

    out = pl.pallas_call(
        kernel,
        out_shape=jax.ShapeDtypeStruct((Mp, Np), jnp.float32),
        grid_spec=pltpu.PrefetchScalarGridSpec(
            num_scalar_prefetch=0,
            grid=grid,
            in_specs=in_specs,
            out_specs=pl.BlockSpec((tm, tn), lambda i, j, k: (i, j)),
            scratch_shapes=[pltpu.VMEM((tm, tn), jnp.float32)],
        ),
        compiler_params=pltpu.CompilerParams(
            dimension_semantics=("parallel", "parallel", "arbitrary"),
            vmem_limit_bytes=32 * 1024 * 1024,
        ),
        cost_estimate=cost,
    )(*args)

    return out[:M, :N]


# ----------------------------------------------------------------------------
# Plain-JAX glue: im2col, weight reshape, BN folding
# ----------------------------------------------------------------------------
def im2col(x_nhwc, ksize, stride, pad):
    """Returns ((N*Ho*Wo, ksize*ksize*C) patches, (N, Ho, Wo))."""
    N, H, W, C = x_nhwc.shape
    xp = jnp.pad(x_nhwc, ((0, 0), (pad, pad), (pad, pad), (0, 0)))
    Ho = (H + 2 * pad - ksize) // stride + 1
    Wo = (W + 2 * pad - ksize) // stride + 1
    cols = []
    for kh in range(ksize):
        for kw in range(ksize):
            cols.append(
                xp[:, kh:kh + Ho * stride:stride, kw:kw + Wo * stride:stride, :]
            )
    patches = jnp.concatenate(cols, axis=-1)  # (N, Ho, Wo, k*k*C)
    return patches.reshape(N * Ho * Wo, ksize * ksize * C), (N, Ho, Wo)


def conv_weight_to_mat(w_oihw):
    """PyTorch (Cout, Cin, kh, kw) -> im2col matmul weight (kh*kw*Cin, Cout)."""
    cout = w_oihw.shape[0]
    return jnp.transpose(w_oihw, (2, 3, 1, 0)).reshape(-1, cout)


def bn_fold(gamma, beta, mean, var, eps=1e-5):
    scale = gamma / jnp.sqrt(var + eps)
    bias = beta - mean * scale
    return scale, bias


# ----------------------------------------------------------------------------
# ResidualBlock forward (NCHW in / NCHW out, like the PyTorch module)
# ----------------------------------------------------------------------------
@functools.partial(jax.jit, static_argnums=2)
def residual_block(x_nchw, params, stride):
    x = jnp.transpose(x_nchw, (0, 2, 3, 1))  # NCHW -> NHWC
    N, H, W, Cin = x.shape
    Cout = params["w1"].shape[0]

    # conv1 (3x3, stride, pad=1) + bn1 + relu
    p1, (_, Ho, Wo) = im2col(x, 3, stride, 1)
    s1, b1 = bn_fold(*params["bn1"])
    out1 = matmul_affine(p1, conv_weight_to_mat(params["w1"]), s1, b1, relu=True)
    out1_img = out1.reshape(N, Ho, Wo, Cout)

    # conv2 (3x3, stride=1, pad=1) + bn2 + shortcut + relu
    p2, _ = im2col(out1_img, 3, 1, 1)
    s2, b2 = bn_fold(*params["bn2"])
    w2 = conv_weight_to_mat(params["w2"])

    if stride != 1 or Cin != Cout:
        # Projection shortcut (1x1 conv + BN) fused into the conv2 matmul:
        #   out = relu( [p2 | xs] @ [[w2*s2],[ws*ss]] + (b2 + bs) )
        xs = x[:, ::stride, ::stride, :].reshape(N * Ho * Wo, Cin)
        ws = params["ws"].reshape(Cout, Cin).T  # (Cin, Cout)
        ss, bs = bn_fold(*params["bns"])
        p_cat = jnp.concatenate([p2, xs], axis=1)
        w_cat = jnp.concatenate([w2 * s2[None, :], ws * ss[None, :]], axis=0)
        ones = jnp.ones((Cout,), jnp.float32)
        out = matmul_affine(p_cat, w_cat, ones, b2 + bs, relu=True)
    else:
        # Identity shortcut streamed per-tile into the conv2 epilogue.
        shortcut = x.reshape(N * Ho * Wo, Cin)
        out = matmul_affine(p2, w2, s2, b2, residual=shortcut, relu=True)

    out = out.reshape(N, Ho, Wo, Cout)
    return jnp.transpose(out, (0, 3, 1, 2))  # NHWC -> NCHW


# ----------------------------------------------------------------------------
# Pure-JAX reference (lax.conv, f32) for correctness checking
# ----------------------------------------------------------------------------
def _conv_ref(x_nhwc, w_oihw, stride, pad):
    w_hwio = jnp.transpose(w_oihw, (2, 3, 1, 0))
    return jax.lax.conv_general_dilated(
        x_nhwc, w_hwio, window_strides=(stride, stride),
        padding=[(pad, pad), (pad, pad)],
        dimension_numbers=("NHWC", "HWIO", "NHWC"),
    )


def residual_block_ref(x_nchw, params, stride):
    x = jnp.transpose(x_nchw, (0, 2, 3, 1))
    Cin = x.shape[-1]
    Cout = params["w1"].shape[0]
    s1, b1 = bn_fold(*params["bn1"])
    out = jax.nn.relu(_conv_ref(x, params["w1"], stride, 1) * s1 + b1)
    s2, b2 = bn_fold(*params["bn2"])
    out = _conv_ref(out, params["w2"], 1, 1) * s2 + b2
    if stride != 1 or Cin != Cout:
        ss, bs = bn_fold(*params["bns"])
        sc = _conv_ref(x, params["ws"], stride, 0) * ss + bs
    else:
        sc = x
    out = jax.nn.relu(out + sc)
    return jnp.transpose(out, (0, 3, 1, 2))


# ----------------------------------------------------------------------------
# Deterministic parameter init
# ----------------------------------------------------------------------------
def make_params(key, in_channels, out_channels, stride):
    ks = jax.random.split(key, 12)

    def bn_params(k):
        kg, kb, km, kv = jax.random.split(k, 4)
        gamma = jax.random.uniform(kg, (out_channels,), jnp.float32, 0.5, 1.5)
        beta = jax.random.normal(kb, (out_channels,), jnp.float32) * 0.1
        mean = jax.random.normal(km, (out_channels,), jnp.float32) * 0.1
        var = jax.random.uniform(kv, (out_channels,), jnp.float32, 0.5, 1.5)
        return (gamma, beta, mean, var)

    params = {
        "w1": jax.random.normal(ks[0], (out_channels, in_channels, 3, 3),
                                jnp.float32) * 0.1,
        "bn1": bn_params(ks[1]),
        "w2": jax.random.normal(ks[2], (out_channels, out_channels, 3, 3),
                                jnp.float32) * 0.1,
        "bn2": bn_params(ks[3]),
    }
    if stride != 1 or in_channels != out_channels:
        params["ws"] = jax.random.normal(
            ks[4], (out_channels, in_channels, 1, 1), jnp.float32) * 0.1
        params["bns"] = bn_params(ks[5])
    return params


if __name__ == "__main__":
    key = jax.random.PRNGKey(0)
    k_x1, k_p1, k_x2, k_p2 = jax.random.split(key, 4)

    # bf16 MXU operands with f32 accumulation -> compare against the f32
    # lax.conv reference with a bf16-appropriate tolerance.
    TOL = 3e-2

    # Case 1: downsampling block with projection shortcut (4 -> 8, stride 2).
    x1 = jax.random.normal(k_x1, (2, 4, 16, 16), jnp.float32)  # NCHW
    p1 = make_params(k_p1, 4, 8, 2)
    out1 = jax.block_until_ready(residual_block(x1, p1, 2))
    ref1 = jax.block_until_ready(residual_block_ref(x1, p1, 2))
    assert out1.shape == ref1.shape == (2, 8, 8, 8), out1.shape
    assert jnp.allclose(out1, ref1, atol=TOL, rtol=TOL), (
        float(jnp.max(jnp.abs(out1 - ref1))))

    # Case 2: identity-shortcut block (8 -> 8, stride 1).
    x2 = jax.random.normal(k_x2, (2, 8, 16, 16), jnp.float32)  # NCHW
    p2 = make_params(k_p2, 8, 8, 1)
    out2 = jax.block_until_ready(residual_block(x2, p2, 1))
    ref2 = jax.block_until_ready(residual_block_ref(x2, p2, 1))
    assert out2.shape == ref2.shape == (2, 8, 16, 16), out2.shape
    assert jnp.allclose(out2, ref2, atol=TOL, rtol=TOL), (
        float(jnp.max(jnp.abs(out2 - ref2))))

    print("KERNEL_OK")
</pallas_src>

<mosaic_0001>
module attributes {stable_mosaic.version = 11 : i64} {
  func.func @_fused_matmul_kernel(%arg0: i32, %arg1: i32, %arg2: i32, %arg3: memref<128x128xbf16, #tpu.memory_space<vmem>>, %arg4: memref<128x128xbf16, #tpu.memory_space<vmem>>, %arg5: memref<1x128xf32, #tpu.memory_space<vmem>>, %arg6: memref<1x128xf32, #tpu.memory_space<vmem>>, %arg7: memref<128x128xf32, #tpu.memory_space<vmem>>, %arg8: memref<128x128xf32, #tpu.memory_space<vmem>>) attributes {dimension_semantics = [#tpu.dimension_semantics<parallel>, #tpu.dimension_semantics<parallel>, #tpu.dimension_semantics<arbitrary>], iteration_bounds = array<i64: 1, 1, 1>, scalar_prefetch = 0 : i64, scratch_operands = 1 : i64, tpu.core_type = #tpu.core_type<tc>, window_params = [{transform_indices = @transform_0, window_bounds = array<i64: 128, 128>}, {transform_indices = @transform_1, window_bounds = array<i64: 128, 128>}, {transform_indices = @transform_2, window_bounds = array<i64: 1, 128>}, {transform_indices = @transform_3, window_bounds = array<i64: 1, 128>}, {transform_indices = @transform_4, window_bounds = array<i64: 128, 128>}]} {
    %c0_i32 = arith.constant 0 : i32
    %0 = arith.cmpi eq, %arg2, %c0_i32 : i32
    %1 = arith.extui %0 : i1 to i32
    %c0_i32_0 = arith.constant 0 : i32
    %2 = arith.cmpi ne, %1, %c0_i32_0 : i32
    scf.if %2 {
      %cst_10 = arith.constant 0.000000e+00 : f32
      %12 = vector.broadcast %cst_10 : f32 to vector<128x128xf32>
      %c0_11 = arith.constant 0 : index
      %c0_12 = arith.constant 0 : index
      %13 = vector.load %arg8[%c0_11, %c0_12] : memref<128x128xf32, #tpu.memory_space<vmem>>, vector<128x128xf32>
      tpu.vector_store %arg8[%c0_11, %c0_12], %12 {strides = array<i32>} : memref<128x128xf32, #tpu.memory_space<vmem>>, vector<128x128xf32>,
    } else {
    }
    %c0 = arith.constant 0 : index
    %c0_1 = arith.constant 0 : index
    %3 = vector.load %arg8[%c0, %c0_1] : memref<128x128xf32, #tpu.memory_space<vmem>>, vector<128x128xf32>
    %c0_2 = arith.constant 0 : index
    %c0_3 = arith.constant 0 : index
    %4 = vector.load %arg3[%c0_2, %c0_3] : memref<128x128xbf16, #tpu.memory_space<vmem>>, vector<128x128xbf16>
    %c0_4 = arith.constant 0 : index
    %c0_5 = arith.constant 0 : index
    %5 = vector.load %arg4[%c0_4, %c0_5] : memref<128x128xbf16, #tpu.memory_space<vmem>>, vector<128x128xbf16>
    %cst = arith.constant dense<0.000000e+00> : vector<128x128xf32>
    %6 = tpu.matmul %4, %5, %cst {dimension_numbers = #tpu.dot_dimension_numbers<[1], [0], [0], [1], [0, 0, 1, 1], [], []>} : vector<128x128xbf16>, vector<128x128xbf16>, vector<128x128xf32> -> vector<128x128xf32>
    %7 = arith.addf %3, %6 : vector<128x128xf32>
    %c0_6 = arith.constant 0 : index
    %c0_7 = arith.constant 0 : index
    %8 = vector.load %arg8[%c0_6, %c0_7] : memref<128x128xf32, #tpu.memory_space<vmem>>, vector<128x128xf32>
    tpu.vector_store %arg8[%c0_6, %c0_7], %7 {strides = array<i32>} : memref<128x128xf32, #tpu.memory_space<vmem>>, vector<128x128xf32>,
    %c0_i32_8 = arith.constant 0 : i32
    %9 = arith.cmpi eq, %arg2, %c0_i32_8 : i32
    %10 = arith.extui %9 : i1 to i32
    %c0_i32_9 = arith.constant 0 : i32
    %11 = arith.cmpi ne, %10, %c0_i32_9 : i32
    scf.if %11 {
      %c0_10 = arith.constant 0 : index
      %c0_11 = arith.constant 0 : index
      %12 = vector.load %arg8[%c0_10, %c0_11] : memref<128x128xf32, #tpu.memory_space<vmem>>, vector<128x128xf32>
      %c0_12 = arith.constant 0 : index
      %c0_13 = arith.constant 0 : index
      %13 = vector.load %arg5[%c0_12, %c0_13] : memref<1x128xf32, #tpu.memory_space<vmem>>, vector<1x128xf32>
      %14 = vector.broadcast %13 : vector<1x128xf32> to vector<128x128xf32>
      %15 = arith.mulf %12, %14 : vector<128x128xf32>
      %c0_14 = arith.constant 0 : index
      %c0_15 = arith.constant 0 : index
      %16 = vector.load %arg6[%c0_14, %c0_15] : memref<1x128xf32, #tpu.memory_space<vmem>>, vector<1x128xf32>
      %17 = vector.broadcast %16 : vector<1x128xf32> to vector<128x128xf32>
      %18 = arith.addf %15, %17 : vector<128x128xf32>
      %cst_16 = arith.constant 0.000000e+00 : f32
      %19 = vector.broadcast %cst_16 : f32 to vector<128x128xf32>
      %20 = arith.maximumf %18, %19 : vector<128x128xf32>
      %c0_17 = arith.constant 0 : index
      %c0_18 = arith.constant 0 : index
      %21 = vector.load %arg7[%c0_17, %c0_18] : memref<128x128xf32, #tpu.memory_space<vmem>>, vector<128x128xf32>
      tpu.vector_store %arg7[%c0_17, %c0_18], %20 {strides = array<i32>} : memref<128x128xf32, #tpu.memory_space<vmem>>, vector<128x128xf32>,
    } else {
    }
    return
  }
  func.func @transform_0(%arg0: i32, %arg1: i32, %arg2: i32) -> (i32, i32) {
    %c0_i32 = arith.constant 0 : i32
    return %arg0, %arg2 : i32, i32
  }
  func.func @transform_1(%arg0: i32, %arg1: i32, %arg2: i32) -> (i32, i32) {
    %c0_i32 = arith.constant 0 : i32
    return %arg2, %arg1 : i32, i32
  }
  func.func @transform_2(%arg0: i32, %arg1: i32, %arg2: i32) -> (i32, i32) {
    %c0_i32 = arith.constant 0 : i32
    %c0_i32_0 = arith.constant 0 : i32
    return %c0_i32, %arg1 : i32, i32
  }
  func.func @transform_3(%arg0: i32, %arg1: i32, %arg2: i32) -> (i32, i32) {
    %c0_i32 = arith.constant 0 : i32
    %c0_i32_0 = arith.constant 0 : i32
    return %c0_i32, %arg1 : i32, i32
  }
  func.func @transform_4(%arg0: i32, %arg1: i32, %arg2: i32) -> (i32, i32) {
    %c0_i32 = arith.constant 0 : i32
    return %arg0, %arg1 : i32, i32
  }
}

</mosaic_0001>

<bundles_post_ra>
// kernel: residual_block.2
= control target key start
LH: loop header
LB: loop body
LE: loop exit
PB: predicated region body
PF: predicated region fallthrough
CT: control target
= control target key end

     0   :  { %s626_s1 = inlined_call_operand.vmem [shape: bf16[128,128], index: 1, kind: input, shape index: {}]   ;;  %s627_s2 = inlined_call_operand.vmem [shape: f32[1,128], index: 2, kind: input, shape index: {}]   ;;  %s628_s3 = inlined_call_operand.vmem [shape: f32[1,128], index: 3, kind: input, shape index: {}]   ;;  %s629_s0 = inlined_call_operand.vmem [shape: bf16[128,128], index: 0, kind: input, shape index: {}]   ;;  %s630_s4 = inlined_call_operand.vmem [shape: f32[128,128], index: 4, kind: output, shape index: {}]  }
   0x1   :  { %v436_v0 = vld [vmem:[%s626_s1 + $0x38] sm:$0xff]  ;;  %v435_v1 = vld [vmem:[%s626_s1 + $0x30] sm:$0xff]  ;;  %v434_v2 = vld [vmem:[%s626_s1 + $0x28] sm:$0xff] }
   0x2   :  { %181 = vmatpush.bf16.msra.mxu0 %v436_v0  ;;  %437 = vmatpush.bf16.msra.mxu1 %v436_v0  ;;  %v433_v3 = vld [vmem:[%s626_s1 + $0x20] sm:$0xff]  ;;  %v432_v4 = vld [vmem:[%s626_s1 + $0x18] sm:$0xff]  ;;  %v431_v5 = vld [vmem:[%s626_s1 + $0x10] sm:$0xff] }
   0x3   :  { %438 = vmatpush.bf16.msra.mxu2 %v436_v0  ;;  %439 = vmatpush.bf16.msra.mxu3 %v436_v0  ;;  %v430_v6 = vld [vmem:[%s626_s1 + $0x8] sm:$0xff]  ;;  %v429_v7 = vld [vmem:[%s626_s1] sm:$0xff]  ;;  %v423_v9 = vld [vmem:[%s629_s0 + $0x10] sm:$0xff] }
   0x4   :  { %v421_v8 = vld [vmem:[%s629_s0] sm:$0xff]  ;;  %v427_v11 = vld [vmem:[%s629_s0 + $0x30] sm:$0xff]  ;;  %v422_v12 = vld [vmem:[%s629_s0 + $0x8] sm:$0xff] }
   0x5   :  { %v425_v10 = vld [vmem:[%s629_s0 + $0x20] sm:$0xff]  ;;  %v424_v13 = vld [vmem:[%s629_s0 + $0x18] sm:$0xff]  ;;  %v426_v14 = vld [vmem:[%s629_s0 + $0x28] sm:$0xff] }
   0x6   :  { %182 = vmatpush.bf16.msra.mxu0 %v435_v1  ;;  %440 = vmatpush.bf16.msra.mxu1 %v435_v1  ;;  %v428_v15 = vld [vmem:[%s629_s0 + $0x38] sm:$0xff]  ;;  %v539_v16 = vld [vmem:[%s627_s2] ss:$0 sm:$0xff] }
   0x7   :  { %441 = vmatpush.bf16.msra.mxu2 %v435_v1  ;;  %442 = vmatpush.bf16.msra.mxu3 %v435_v1  ;;  %v544_v17 = vld [vmem:[%s628_s3] ss:$0 sm:$0xff] }
   0xa   :  { %183 = vmatpush.bf16.msra.mxu0 %v434_v2  ;;  %443 = vmatpush.bf16.msra.mxu1 %v434_v2 }
   0xb   :  { %444 = vmatpush.bf16.msra.mxu2 %v434_v2  ;;  %445 = vmatpush.bf16.msra.mxu3 %v434_v2 }
   0xe   :  { %184 = vmatpush.bf16.msra.mxu0 %v433_v3  ;;  %446 = vmatpush.bf16.msra.mxu1 %v433_v3 }
   0xf   :  { %447 = vmatpush.bf16.msra.mxu2 %v433_v3  ;;  %448 = vmatpush.bf16.msra.mxu3 %v433_v3 }
  0x12   :  { %185 = vmatpush.bf16.msra.mxu0 %v432_v4  ;;  %449 = vmatpush.bf16.msra.mxu1 %v432_v4 }
  0x13   :  { %450 = vmatpush.bf16.msra.mxu2 %v432_v4  ;;  %451 = vmatpush.bf16.msra.mxu3 %v432_v4 }
  0x16   :  { %186 = vmatpush.bf16.msra.mxu0 %v431_v5  ;;  %452 = vmatpush.bf16.msra.mxu1 %v431_v5 }
  0x17   :  { %453 = vmatpush.bf16.msra.mxu2 %v431_v5  ;;  %454 = vmatpush.bf16.msra.mxu3 %v431_v5 }
  0x1a   :  { %187 = vmatpush.bf16.msra.mxu0 %v430_v6  ;;  %455 = vmatpush.bf16.msra.mxu1 %v430_v6 }
  0x1b   :  { %456 = vmatpush.bf16.msra.mxu2 %v430_v6  ;;  %457 = vmatpush.bf16.msra.mxu3 %v430_v6 }
  0x1e   :  { %188 = vmatpush.bf16.msra.mxu0 %v429_v7  ;;  %458 = vmatpush.bf16.msra.mxu1 %v429_v7 }
  0x1f   :  { %459 = vmatpush.bf16.msra.mxu2 %v429_v7  ;;  %460 = vmatpush.bf16.msra.mxu3 %v429_v7 }
  0x21   :  { %189 = vmatmul.bf16.vlgmr.msra.gmra.mxu0 %v421_v8  ;;  %199 = vmatmul.bf16.vlgmr.msra.gmra.mxu1 %v423_v9 }
  0x22   :  { %209 = vmatmul.bf16.vlgmr.msra.gmra.mxu2 %v425_v10  ;;  %219 = vmatmul.bf16.vlgmr.msra.gmra.mxu3 %v427_v11 }
  0x31   :  { %194 = vmatmul.bf16.gmra.mxu0 %v422_v12  ;;  %204 = vmatmul.bf16.gmra.mxu1 %v424_v13 }
  0x32   :  { %214 = vmatmul.bf16.gmra.mxu2 %v426_v14  ;;  %224 = vmatmul.bf16.gmra.mxu3 %v428_v15 }
  0x9e   :  { %v190_v18 = vpop.f32.mrf.mxu0  ;;  %v200_v19 = vpop.f32.mrf.mxu1 }
  0x9f   :  { %v285_v20 = vmul.f32 %v539_v16, %v190_v18  ;;  %v289_v21 = vmul.f32 %v539_v16, %v200_v19 }
  0xa1   :  { %v305_v22 = vadd.f32 %v544_v17, %v285_v20  ;;  %v309_v23 = vadd.f32 %v544_v17, %v289_v21 }
  0xa3   :  { %v321_v24 = vmax.f32 %v305_v22, 0.0  ;;  %v325_v25 = vmax.f32 %v309_v23, 0.0 }
  0xa5   :  { %337 = vst [vmem:[%s630_s4] sm:$0xff] %v321_v24  ;;  %v210_v26 = vpop.f32.mrf.mxu2  ;;  %v220_v27 = vpop.f32.mrf.mxu3 }
  0xa6   :  { %341 = vst [vmem:[%s630_s4 + $0x20] sm:$0xff] %v325_v25  ;;  %v293_v28 = vmul.f32 %v539_v16, %v210_v26  ;;  %v297_v29 = vmul.f32 %v539_v16, %v220_v27  ;;  %v192_v30 = vpop.f32.mrf.mxu0  ;;  %v202_v31 = vpop.f32.mrf.mxu1 }
  0xa7   :  { %v286_v32 = vmul.f32 %v539_v16, %v192_v30  ;;  %v290_v33 = vmul.f32 %v539_v16, %v202_v31 }
  0xa8   :  { %v313_v34 = vadd.f32 %v544_v17, %v293_v28  ;;  %v317_v35 = vadd.f32 %v544_v17, %v297_v29 }
  0xa9   :  { %v306_v36 = vadd.f32 %v544_v17, %v286_v32  ;;  %v310_v37 = vadd.f32 %v544_v17, %v290_v33 }
  0xaa   :  { %v329_v38 = vmax.f32 %v313_v34, 0.0  ;;  %v333_v39 = vmax.f32 %v317_v35, 0.0 }
  0xab   :  { %v322_v40 = vmax.f32 %v306_v36, 0.0  ;;  %v326_v41 = vmax.f32 %v310_v37, 0.0 }
  0xac   :  { %345 = vst [vmem:[%s630_s4 + $0x40] sm:$0xff] %v329_v38 }
  0xad   :  { %349 = vst [vmem:[%s630_s4 + $0x60] sm:$0xff] %v333_v39  ;;  %v212_v42 = vpop.f32.mrf.mxu2  ;;  %v222_v43 = vpop.f32.mrf.mxu3 }
  0xae   :  { %338 = vst [vmem:[%s630_s4 + $0x8] sm:$0xff] %v322_v40  ;;  %v294_v44 = vmul.f32 %v539_v16, %v212_v42  ;;  %v298_v45 = vmul.f32 %v539_v16, %v222_v43  ;;  %v195_v46 = vpop.f32.mrf.mxu0  ;;  %v205_v47 = vpop.f32.mrf.mxu1 }
  0xaf   :  { %342 = vst [vmem:[%s630_s4 + $0x28] sm:$0xff] %v326_v41  ;;  %v287_v48 = vmul.f32 %v539_v16, %v195_v46  ;;  %v291_v49 = vmul.f32 %v539_v16, %v205_v47 }
  0xb0   :  { %v314_v50 = vadd.f32 %v544_v17, %v294_v44  ;;  %v318_v51 = vadd.f32 %v544_v17, %v298_v45 }
  0xb1   :  { %v307_v52 = vadd.f32 %v544_v17, %v287_v48  ;;  %v311_v53 = vadd.f32 %v544_v17, %v291_v49 }
  0xb2   :  { %v330_v54 = vmax.f32 %v314_v50, 0.0  ;;  %v334_v55 = vmax.f32 %v318_v51, 0.0 }
  0xb3   :  { %v323_v56 = vmax.f32 %v307_v52, 0.0  ;;  %v327_v57 = vmax.f32 %v311_v53, 0.0 }
  0xb4   :  { %346 = vst [vmem:[%s630_s4 + $0x48] sm:$0xff] %v330_v54 }
  0xb5   :  { %350 = vst [vmem:[%s630_s4 + $0x68] sm:$0xff] %v334_v55  ;;  %v215_v58 = vpop.f32.mrf.mxu2  ;;  %v225_v59 = vpop.f32.mrf.mxu3 }
  0xb6   :  { %339 = vst [vmem:[%s630_s4 + $0x10] sm:$0xff] %v323_v56  ;;  %v295_v60 = vmul.f32 %v539_v16, %v215_v58  ;;  %v299_v61 = vmul.f32 %v539_v16, %v225_v59  ;;  %v197_v62 = vpop.f32.mrf.mxu0  ;;  %v207_v63 = vpop.f32.mrf.mxu1 }
  0xb7   :  { %343 = vst [vmem:[%s630_s4 + $0x30] sm:$0xff] %v327_v57  ;;  %v288_v0 = vmul.f32 %v539_v16, %v197_v62  ;;  %v292_v1 = vmul.f32 %v539_v16, %v207_v63 }
  0xb8   :  { %v315_v2 = vadd.f32 %v544_v17, %v295_v60  ;;  %v319_v3 = vadd.f32 %v544_v17, %v299_v61 }
  0xb9   :  { %v308_v4 = vadd.f32 %v544_v17, %v288_v0  ;;  %v312_v5 = vadd.f32 %v544_v17, %v292_v1 }
  0xba   :  { %v331_v6 = vmax.f32 %v315_v2, 0.0  ;;  %v335_v7 = vmax.f32 %v319_v3, 0.0 }
  0xbb   :  { %v324_v8 = vmax.f32 %v308_v4, 0.0  ;;  %v328_v9 = vmax.f32 %v312_v5, 0.0 }
  0xbc   :  { %347 = vst [vmem:[%s630_s4 + $0x50] sm:$0xff] %v331_v6 }
  0xbd   :  { %351 = vst [vmem:[%s630_s4 + $0x70] sm:$0xff] %v335_v7  ;;  %v217_v10 = vpop.f32.mrf.mxu2  ;;  %v227_v11 = vpop.f32.mrf.mxu3 }
  0xbe   :  { %340 = vst [vmem:[%s630_s4 + $0x18] sm:$0xff] %v324_v8  ;;  %v296_v12 = vmul.f32 %v539_v16, %v217_v10  ;;  %v300_v13 = vmul.f32 %v539_v16, %v227_v11 }
  0xbf   :  { %344 = vst [vmem:[%s630_s4 + $0x38] sm:$0xff] %v328_v9 }
  0xc0   :  { %v316_v14 = vadd.f32 %v544_v17, %v296_v12  ;;  %v320_v15 = vadd.f32 %v544_v17, %v300_v13 }
  0xc2   :  { %v332_v18 = vmax.f32 %v316_v14, 0.0  ;;  %v336_v19 = vmax.f32 %v320_v15, 0.0 }
  0xc4   :  { %348 = vst [vmem:[%s630_s4 + $0x58] sm:$0xff] %v332_v18 }
  0xc5   :  { %352 = vst [vmem:[%s630_s4 + $0x78] sm:$0xff] %v336_v19 }

</bundles_post_ra>
